<compile_context>
chip_gen: v5e
topology: v5e:2x2
jax: 0.10.0
libtpu: 0.0.40
codegen_flags: <defaults>
</compile_context>

<pallas_src>
import functools

import jax
import jax.numpy as jnp
from jax.experimental import pallas as pl
from jax.experimental.pallas import tpu as pltpu

LN_EPS = 1e-5        # PyTorch nn.LayerNorm default
_SUBLANE = 16        # bf16 sublane tile -> pad S to a multiple of 16
_MIB = 1024 * 1024


def _layernorm(x, gamma, beta):
    mu = jnp.mean(x, axis=-1, keepdims=True)
    var = jnp.mean((x - mu) * (x - mu), axis=-1, keepdims=True)
    return (x - mu) * jax.lax.rsqrt(var + LN_EPS) * gamma + beta


@functools.lru_cache(maxsize=None)
def _single_buffer_weights_supported():
    """Probe once whether pipeline_mode=pl.Buffered(1) (single-buffered,
    replicated weight blocks) is supported and numerically correct on this
    Pallas build, using a bf16 weight block like the real kernel.  Any
    construction / lowering / value failure -> fall back to double buffering."""
    try:
        def _probe(x_ref, w_ref, o_ref):
            o_ref[...] = x_ref[...] + w_ref[...].astype(jnp.float32)

        x = jnp.arange(2 * 16 * 256, dtype=jnp.float32).reshape(2, 16, 256)
        w = jnp.ones((16, 256), jnp.bfloat16)
        out = pl.pallas_call(
            _probe,
            out_shape=jax.ShapeDtypeStruct((2, 16, 256), jnp.float32),
            grid_spec=pltpu.PrefetchScalarGridSpec(
                num_scalar_prefetch=0,
                grid=(2,),
                in_specs=[
                    pl.BlockSpec((1, 16, 256), lambda b: (b, 0, 0)),
                    pl.BlockSpec((16, 256), lambda b: (0, 0),
                                 pipeline_mode=pl.Buffered(1)),
                ],
                out_specs=pl.BlockSpec((1, 16, 256), lambda b: (b, 0, 0)),
            ),
        )(x, w)
        return bool(jnp.allclose(out, x + 1.0))
    except Exception:        # any failure -> safe fallback
        return False


def _vmem_ceiling_bytes():
    """Generation-aware VMEM ceiling: physical capacity minus headroom for
    Mosaic internal scratch and the double-buffered x/o blocks."""
    try:
        cap = int(pltpu.get_tpu_info().vmem_capacity_bytes)
    except Exception:
        cap = 128 * _MIB                       # v5e/v6e default
    return max(cap - 8 * _MIB, cap // 2)       # ~56 MiB v7x, ~120 MiB v5e/v6e


def vit_encoder_layer_kernel(
    x_ref,                      # (1, S, D) f32
    g1_ref, bta1_ref,           # LayerNorm1 gamma / beta      (1, D) f32
    wq_ref, bq_ref,             # (D, D) bf16, (1, D) f32
    wk_ref, bk_ref,
    wv_ref, bv_ref,
    wo_ref, bo_ref,
    g2_ref, bta2_ref,           # LayerNorm2 gamma / beta      (1, D) f32
    w1_ref, b1_ref,             # (D, F) bf16, (1, F) f32
    w2_ref, b2_ref,             # (F, D) bf16, (1, D) f32
    o_ref,                      # (1, S, D) f32
    ctx_ref,                    # VMEM scratch (S, D) bf16: attention context
    *, num_heads, seq_len,
):
    f32, bf16 = jnp.float32, jnp.bfloat16

    x = x_ref[0]                                   # (S, D) f32
    S, D = x.shape
    H = num_heads
    dh = D // H
    scale = 1.0 / (dh ** 0.5)

    # ---- sub-layer 1: pre-LN multi-head self-attention + residual ----------
    z = _layernorm(x, g1_ref[...], bta1_ref[...])  # f32 LayerNorm
    zb = z.astype(bf16)                            # bf16 operands, f32 accum

    # Fold 1/sqrt(dh) into q (S*D muls instead of H*S*S); cast q/k/v to bf16
    # once, full width, so the head loop only slices bf16 tensors.
    q = ((jnp.dot(zb, wq_ref[...], preferred_element_type=f32)
          + bq_ref[...]) * scale).astype(bf16)
    k = (jnp.dot(zb, wk_ref[...], preferred_element_type=f32)
         + bk_ref[...]).astype(bf16)
    v = (jnp.dot(zb, wv_ref[...], preferred_element_type=f32)
         + bv_ref[...]).astype(bf16)

    # Key mask for wrapper-side sequence padding (traced only when padded).
    kmask = None
    if seq_len != S:
        kidx = jax.lax.broadcasted_iota(jnp.int32, (1, S), 1)
        kmask = jnp.where(kidx < seq_len, 0.0, -1e30).astype(f32)

    # Per-head attention on 2-D (S, dh) slices.  Heads are processed in pairs
    # when H is even so the ctx-scratch store is 2*dh lanes wide (128-lane
    # aligned for dh=64).  Each head (pair) writes straight into the VMEM
    # scratch -> no H-way lane concatenate, only one pair's context live.
    hpg = 2 if H % 2 == 0 else 1
    gw = hpg * dh
    for g in range(H // hpg):
        glo = g * gw
        parts = []
        for hh in range(hpg):
            lo = glo + hh * dh
            qh = q[:, lo:lo + dh]
            kh = k[:, lo:lo + dh]
            vh = v[:, lo:lo + dh]
            s = jax.lax.dot_general(qh, kh, (((1,), (1,)), ((), ())),
                                    preferred_element_type=f32)   # (S, S)
            if kmask is not None:
                s = s + kmask
            m = jnp.max(s, axis=-1, keepdims=True)
            p = jnp.exp(s - m)
            # EUP approx reciprocal instead of a VALU divide.
            inv = pl.reciprocal(jnp.sum(p, axis=-1, keepdims=True), approx=True)
            p = (p * inv).astype(bf16)
            parts.append(jnp.dot(p, vh, preferred_element_type=f32))
        chunk = parts[0] if hpg == 1 else jnp.concatenate(parts, axis=-1)
        ctx_ref[:, glo:glo + gw] = chunk.astype(bf16)

    attn_out = (jnp.dot(ctx_ref[...], wo_ref[...], preferred_element_type=f32)
                + bo_ref[...])
    x1 = attn_out + x                              # residual (f32)

    # ---- sub-layer 2: pre-LN FFN + residual ---------------------------------
    z2 = _layernorm(x1, g2_ref[...], bta2_ref[...]).astype(bf16)
    h = jnp.dot(z2, w1_ref[...], preferred_element_type=f32) + b1_ref[...]
    # TODO(synk): PyTorch nn.GELU defaults to the exact erf form; using JAX's
    # tanh-approximate GELU here (erf lowering in Mosaic is not guaranteed on
    # all jax versions).
    h = jax.nn.gelu(h).astype(bf16)
    ffn_out = jnp.dot(h, w2_ref[...], preferred_element_type=f32) + b2_ref[...]

    o_ref[0] = (ffn_out + x1).astype(o_ref.dtype)


def vit_encoder_layer(x, params, *, num_heads):
    """x: (B, S, D) float32.  params: dict of weights (see init_params)."""
    B, S, D = x.shape
    F = params['w1'].shape[1]
    assert D % num_heads == 0

    # Pad the sequence to a bf16 sublane multiple (16) so every bf16 vreg on
    # the attention path is fully packed; padded key columns masked in-kernel.
    S_pad = -(-S // _SUBLANE) * _SUBLANE
    x_in = x if S_pad == S else jnp.pad(x, ((0, 0), (0, S_pad - S), (0, 0)))

    # Replicated-weight spec: block index never changes over the batch grid,
    # so single-buffer when supported (default double-buffering keeps a full
    # extra copy of every weight in VMEM for nothing).
    if _single_buffer_weights_supported():
        def wspec(shape):
            return pl.BlockSpec(shape, lambda b: (0, 0),
                                pipeline_mode=pl.Buffered(1))
    else:
        def wspec(shape):
            return pl.BlockSpec(shape, lambda b: (0, 0))

    in_specs = [
        pl.BlockSpec((1, S_pad, D), lambda b: (b, 0, 0)),   # x
        wspec((1, D)), wspec((1, D)),                       # ln1 gamma, beta
        wspec((D, D)), wspec((1, D)),                       # wq, bq
        wspec((D, D)), wspec((1, D)),                       # wk, bk
        wspec((D, D)), wspec((1, D)),                       # wv, bv
        wspec((D, D)), wspec((1, D)),                       # wo, bo
        wspec((1, D)), wspec((1, D)),                       # ln2 gamma, beta
        wspec((D, F)), wspec((1, F)),                       # w1, b1
        wspec((F, D)), wspec((1, D)),                       # w2, b2
    ]

    # VMEM budget: resident bf16 weights (x2 if the single-buffer probe
    # failed) + double-buffered x/o blocks + live intermediates, with margin,
    # clamped to a generation-aware ceiling (capacity - headroom).
    param_bytes = sum(int(v.size) * v.dtype.itemsize for v in params.values())
    act_bytes = (2 * 2 * S_pad * D * 4            # x / o blocks (double-buffered)
                 + 10 * S_pad * D * 4             # z, q, k, v, ctx, x1, ...
                 + 3 * S_pad * F * 4              # FFN hidden (+ bf16 copy)
                 + 4 * S_pad * S_pad * 4)         # per-head scores / probs
    vmem_limit = int(min(max(2 * (2 * param_bytes + act_bytes), 32 * _MIB),
                         _vmem_ceiling_bytes()))

    flops = B * (2 * S_pad * D * D * 4            # q/k/v/o projections
                 + 2 * S_pad * S_pad * D * 2      # q@k^T and p@v
                 + 2 * S_pad * D * F * 2)         # FFN
    transcendentals = B * (S_pad * S_pad * num_heads + S_pad * F)
    bytes_accessed = 2 * B * S_pad * D * 4 + param_bytes

    kernel = functools.partial(vit_encoder_layer_kernel,
                               num_heads=num_heads, seq_len=S)

    out = pl.pallas_call(
        kernel,
        out_shape=jax.ShapeDtypeStruct((B, S_pad, D), x.dtype),
        grid_spec=pltpu.PrefetchScalarGridSpec(
            num_scalar_prefetch=0,
            grid=(B,),          # v7x: keep B even and >= 2 so both TCs run
            in_specs=in_specs,
            out_specs=pl.BlockSpec((1, S_pad, D), lambda b: (b, 0, 0)),
            scratch_shapes=[pltpu.VMEM((S_pad, D), jnp.bfloat16)],  # ctx slab
        ),
        compiler_params=pltpu.CompilerParams(
            dimension_semantics=("parallel",),
            vmem_limit_bytes=vmem_limit),
        cost_estimate=pl.CostEstimate(flops=int(flops),
                                      transcendentals=int(transcendentals),
                                      bytes_accessed=int(bytes_accessed)),
    )(
        x_in,
        params['g1'], params['bta1'],
        params['wq'], params['bq'],
        params['wk'], params['bk'],
        params['wv'], params['bv'],
        params['wo'], params['bo'],
        params['g2'], params['bta2'],
        params['w1'], params['b1'],
        params['w2'], params['b2'],
    )
    return out if S_pad == S else out[:, :S, :]


def init_params(key, d_model, d_ff):
    ks = jax.random.split(key, 12)
    s = 0.02
    f32, bf16 = jnp.float32, jnp.bfloat16

    def w(k, shape):   # bf16 weights: native MXU dtype, half the HBM/VMEM
        return (s * jax.random.normal(k, shape, f32)).astype(bf16)

    def b(k, shape):   # biases stay f32 (added after the f32 accumulation)
        return s * jax.random.normal(k, shape, f32)

    return {
        'g1':   jnp.ones((1, d_model), f32),
        'bta1': jnp.zeros((1, d_model), f32),
        'wq':   w(ks[0], (d_model, d_model)), 'bq': b(ks[6], (1, d_model)),
        'wk':   w(ks[1], (d_model, d_model)), 'bk': b(ks[7], (1, d_model)),
        'wv':   w(ks[2], (d_model, d_model)), 'bv': b(ks[8], (1, d_model)),
        'wo':   w(ks[3], (d_model, d_model)), 'bo': b(ks[9], (1, d_model)),
        'g2':   jnp.ones((1, d_model), f32),
        'bta2': jnp.zeros((1, d_model), f32),
        'w1':   w(ks[4], (d_model, d_ff)),    'b1': b(ks[10], (1, d_ff)),
        'w2':   w(ks[5], (d_ff, d_model)),    'b2': b(ks[11], (1, d_model)),
    }


def _reference(x, p, num_heads):
    """Pure-JAX reference with matching bf16-operand / f32-accumulate math."""
    B, S, D = x.shape
    H, dh = num_heads, D // num_heads
    f32, bf16 = jnp.float32, jnp.bfloat16

    def ln(t, g, b):
        mu = jnp.mean(t, -1, keepdims=True)
        var = jnp.mean((t - mu) ** 2, -1, keepdims=True)
        return (t - mu) * jax.lax.rsqrt(var + LN_EPS) * g + b

    def mm(a, w):
        return jnp.dot(a.astype(bf16), w, preferred_element_type=f32)

    z = ln(x, p['g1'], p['bta1'])
    q = ((mm(z, p['wq']) + p['bq']) / (dh ** 0.5)).astype(bf16)
    k = (mm(z, p['wk']) + p['bk']).astype(bf16)
    v = (mm(z, p['wv']) + p['bv']).astype(bf16)
    qh = q.reshape(B, S, H, dh)
    kh = k.reshape(B, S, H, dh)
    vh = v.reshape(B, S, H, dh)
    sc = jnp.einsum('bqhd,bkhd->bhqk', qh, kh, preferred_element_type=f32)
    a = jax.nn.softmax(sc, axis=-1).astype(bf16)
    ctx = jnp.einsum('bhqk,bkhd->bqhd', a, vh,
                     preferred_element_type=f32).reshape(B, S, D)
    x1 = mm(ctx, p['wo']) + p['bo'] + x
    z2 = ln(x1, p['g2'], p['bta2'])
    h = jax.nn.gelu(mm(z2, p['w1']) + p['b1'])
    return mm(h, p['w2']) + p['b2'] + x1


if __name__ == "__main__":
    num_heads, d_model, d_ff = 4, 32, 64
    B, S = 2, 8

    key = jax.random.PRNGKey(0)
    kx, kp = jax.random.split(key)
    x = jax.random.normal(kx, (B, S, d_model), jnp.float32)
    params = init_params(kp, d_model, d_ff)

    fn = jax.jit(functools.partial(vit_encoder_layer, num_heads=num_heads))
    out = jax.block_until_ready(fn(x, params))

    ref = _reference(x, params, num_heads)
    assert out.shape == (B, S, d_model)
    assert jnp.allclose(out, ref, atol=1e-2, rtol=1e-2), "mismatch vs reference"

    print("KERNEL_OK")
</pallas_src>

<mosaic_0001>
module attributes {stable_mosaic.version = 11 : i64} {
  func.func @vit_encoder_layer_kernel(%arg0: i32, %arg1: memref<1x16x32xf32, #tpu.memory_space<vmem>>, %arg2: memref<1x32xf32, #tpu.memory_space<vmem>>, %arg3: memref<1x32xf32, #tpu.memory_space<vmem>>, %arg4: memref<32x32xbf16, #tpu.memory_space<vmem>>, %arg5: memref<1x32xf32, #tpu.memory_space<vmem>>, %arg6: memref<32x32xbf16, #tpu.memory_space<vmem>>, %arg7: memref<1x32xf32, #tpu.memory_space<vmem>>, %arg8: memref<32x32xbf16, #tpu.memory_space<vmem>>, %arg9: memref<1x32xf32, #tpu.memory_space<vmem>>, %arg10: memref<32x32xbf16, #tpu.memory_space<vmem>>, %arg11: memref<1x32xf32, #tpu.memory_space<vmem>>, %arg12: memref<1x32xf32, #tpu.memory_space<vmem>>, %arg13: memref<1x32xf32, #tpu.memory_space<vmem>>, %arg14: memref<32x64xbf16, #tpu.memory_space<vmem>>, %arg15: memref<1x64xf32, #tpu.memory_space<vmem>>, %arg16: memref<64x32xbf16, #tpu.memory_space<vmem>>, %arg17: memref<1x32xf32, #tpu.memory_space<vmem>>, %arg18: memref<1x16x32xf32, #tpu.memory_space<vmem>>, %arg19: memref<16x32xbf16, #tpu.memory_space<vmem>>) attributes {dimension_semantics = [#tpu.dimension_semantics<parallel>], iteration_bounds = array<i64: 2>, scalar_prefetch = 0 : i64, scratch_operands = 1 : i64, tpu.core_type = #tpu.core_type<tc>, window_params = [{transform_indices = @transform_0, window_bounds = array<i64: 1, 16, 32>}, {pipeline_mode = #tpu.pipeline_mode<synchronous>, transform_indices = @transform_1, window_bounds = array<i64: 1, 32>}, {pipeline_mode = #tpu.pipeline_mode<synchronous>, transform_indices = @transform_2, window_bounds = array<i64: 1, 32>}, {pipeline_mode = #tpu.pipeline_mode<synchronous>, transform_indices = @transform_3, window_bounds = array<i64: 32, 32>}, {pipeline_mode = #tpu.pipeline_mode<synchronous>, transform_indices = @transform_4, window_bounds = array<i64: 1, 32>}, {pipeline_mode = #tpu.pipeline_mode<synchronous>, transform_indices = @transform_5, window_bounds = array<i64: 32, 32>}, {pipeline_mode = #tpu.pipeline_mode<synchronous>, transform_indices = @transform_6, window_bounds = array<i64: 1, 32>}, {pipeline_mode = #tpu.pipeline_mode<synchronous>, transform_indices = @transform_7, window_bounds = array<i64: 32, 32>}, {pipeline_mode = #tpu.pipeline_mode<synchronous>, transform_indices = @transform_8, window_bounds = array<i64: 1, 32>}, {pipeline_mode = #tpu.pipeline_mode<synchronous>, transform_indices = @transform_9, window_bounds = array<i64: 32, 32>}, {pipeline_mode = #tpu.pipeline_mode<synchronous>, transform_indices = @transform_10, window_bounds = array<i64: 1, 32>}, {pipeline_mode = #tpu.pipeline_mode<synchronous>, transform_indices = @transform_11, window_bounds = array<i64: 1, 32>}, {pipeline_mode = #tpu.pipeline_mode<synchronous>, transform_indices = @transform_12, window_bounds = array<i64: 1, 32>}, {pipeline_mode = #tpu.pipeline_mode<synchronous>, transform_indices = @transform_13, window_bounds = array<i64: 32, 64>}, {pipeline_mode = #tpu.pipeline_mode<synchronous>, transform_indices = @transform_14, window_bounds = array<i64: 1, 64>}, {pipeline_mode = #tpu.pipeline_mode<synchronous>, transform_indices = @transform_15, window_bounds = array<i64: 64, 32>}, {pipeline_mode = #tpu.pipeline_mode<synchronous>, transform_indices = @transform_16, window_bounds = array<i64: 1, 32>}, {transform_indices = @transform_17, window_bounds = array<i64: 1, 16, 32>}]} {
    %c0 = arith.constant 0 : index
    %c0_0 = arith.constant 0 : index
    %c0_1 = arith.constant 0 : index
    %0 = vector.load %arg1[%c0, %c0_0, %c0_1] : memref<1x16x32xf32, #tpu.memory_space<vmem>>, vector<1x16x32xf32>
    %1 = vector.shape_cast %0 : vector<1x16x32xf32> to vector<16x32xf32>
    %c0_2 = arith.constant 0 : index
    %c0_3 = arith.constant 0 : index
    %2 = vector.load %arg2[%c0_2, %c0_3] : memref<1x32xf32, #tpu.memory_space<vmem>>, vector<1x32xf32>
    %c0_4 = arith.constant 0 : index
    %c0_5 = arith.constant 0 : index
    %3 = vector.load %arg3[%c0_4, %c0_5] : memref<1x32xf32, #tpu.memory_space<vmem>>, vector<1x32xf32>
    %cst = arith.constant dense<0.000000e+00> : vector<16xf32>
    %4 = vector.multi_reduction <add>, %1, %cst [1] : vector<16x32xf32> to vector<16xf32>
    %5 = vector.shape_cast %4 : vector<16xf32> to vector<16x1xf32>
    %cst_6 = arith.constant 3.200000e+01 : f32
    %6 = vector.broadcast %cst_6 : f32 to vector<16x1xf32>
    %7 = arith.divf %5, %6 : vector<16x1xf32>
    %8 = vector.broadcast %7 : vector<16x1xf32> to vector<16x32xf32>
    %9 = arith.subf %1, %8 : vector<16x32xf32>
    %10 = vector.broadcast %7 : vector<16x1xf32> to vector<16x32xf32>
    %11 = arith.subf %1, %10 : vector<16x32xf32>
    %12 = arith.mulf %9, %11 : vector<16x32xf32>
    %cst_7 = arith.constant dense<0.000000e+00> : vector<16xf32>
    %13 = vector.multi_reduction <add>, %12, %cst_7 [1] : vector<16x32xf32> to vector<16xf32>
    %14 = vector.shape_cast %13 : vector<16xf32> to vector<16x1xf32>
    %cst_8 = arith.constant 3.200000e+01 : f32
    %15 = vector.broadcast %cst_8 : f32 to vector<16x1xf32>
    %16 = arith.divf %14, %15 : vector<16x1xf32>
    %17 = vector.broadcast %7 : vector<16x1xf32> to vector<16x32xf32>
    %18 = arith.subf %1, %17 : vector<16x32xf32>
    %cst_9 = arith.constant 9.99999974E-6 : f32
    %19 = vector.broadcast %cst_9 : f32 to vector<16x1xf32>
    %20 = arith.addf %16, %19 : vector<16x1xf32>
    %21 = math.rsqrt %20 : vector<16x1xf32>
    %22 = vector.broadcast %21 : vector<16x1xf32> to vector<16x32xf32>
    %23 = arith.mulf %18, %22 : vector<16x32xf32>
    %24 = vector.broadcast %2 : vector<1x32xf32> to vector<16x32xf32>
    %25 = arith.mulf %23, %24 : vector<16x32xf32>
    %26 = vector.broadcast %3 : vector<1x32xf32> to vector<16x32xf32>
    %27 = arith.addf %25, %26 : vector<16x32xf32>
    %28 = arith.truncf %27 : vector<16x32xf32> to vector<16x32xbf16>
    %c0_10 = arith.constant 0 : index
    %c0_11 = arith.constant 0 : index
    %29 = vector.load %arg4[%c0_10, %c0_11] : memref<32x32xbf16, #tpu.memory_space<vmem>>, vector<32x32xbf16>
    %cst_12 = arith.constant dense<0.000000e+00> : vector<16x32xf32>
    %30 = tpu.matmul %28, %29, %cst_12 {dimension_numbers = #tpu.dot_dimension_numbers<[1], [0], [0], [1], [0, 0, 1, 1], [], []>} : vector<16x32xbf16>, vector<32x32xbf16>, vector<16x32xf32> -> vector<16x32xf32>
    %c0_13 = arith.constant 0 : index
    %c0_14 = arith.constant 0 : index
    %31 = vector.load %arg5[%c0_13, %c0_14] : memref<1x32xf32, #tpu.memory_space<vmem>>, vector<1x32xf32>
    %32 = vector.broadcast %31 : vector<1x32xf32> to vector<16x32xf32>
    %33 = arith.addf %30, %32 : vector<16x32xf32>
    %cst_15 = arith.constant 0.353553385 : f32
    %34 = vector.broadcast %cst_15 : f32 to vector<16x32xf32>
    %35 = arith.mulf %33, %34 : vector<16x32xf32>
    %36 = arith.truncf %35 : vector<16x32xf32> to vector<16x32xbf16>
    %c0_16 = arith.constant 0 : index
    %c0_17 = arith.constant 0 : index
    %37 = vector.load %arg6[%c0_16, %c0_17] : memref<32x32xbf16, #tpu.memory_space<vmem>>, vector<32x32xbf16>
    %cst_18 = arith.constant dense<0.000000e+00> : vector<16x32xf32>
    %38 = tpu.matmul %28, %37, %cst_18 {dimension_numbers = #tpu.dot_dimension_numbers<[1], [0], [0], [1], [0, 0, 1, 1], [], []>} : vector<16x32xbf16>, vector<32x32xbf16>, vector<16x32xf32> -> vector<16x32xf32>
    %c0_19 = arith.constant 0 : index
    %c0_20 = arith.constant 0 : index
    %39 = vector.load %arg7[%c0_19, %c0_20] : memref<1x32xf32, #tpu.memory_space<vmem>>, vector<1x32xf32>
    %40 = vector.broadcast %39 : vector<1x32xf32> to vector<16x32xf32>
    %41 = arith.addf %38, %40 : vector<16x32xf32>
    %42 = arith.truncf %41 : vector<16x32xf32> to vector<16x32xbf16>
    %c0_21 = arith.constant 0 : index
    %c0_22 = arith.constant 0 : index
    %43 = vector.load %arg8[%c0_21, %c0_22] : memref<32x32xbf16, #tpu.memory_space<vmem>>, vector<32x32xbf16>
    %cst_23 = arith.constant dense<0.000000e+00> : vector<16x32xf32>
    %44 = tpu.matmul %28, %43, %cst_23 {dimension_numbers = #tpu.dot_dimension_numbers<[1], [0], [0], [1], [0, 0, 1, 1], [], []>} : vector<16x32xbf16>, vector<32x32xbf16>, vector<16x32xf32> -> vector<16x32xf32>
    %c0_24 = arith.constant 0 : index
    %c0_25 = arith.constant 0 : index
    %45 = vector.load %arg9[%c0_24, %c0_25] : memref<1x32xf32, #tpu.memory_space<vmem>>, vector<1x32xf32>
    %46 = vector.broadcast %45 : vector<1x32xf32> to vector<16x32xf32>
    %47 = arith.addf %44, %46 : vector<16x32xf32>
    %48 = arith.truncf %47 : vector<16x32xf32> to vector<16x32xbf16>
    %49 = tpu.iota {dimensions = array<i32: 1>} : vector<1x16xi32>
    %c8_i32 = arith.constant 8 : i32
    %50 = vector.broadcast %c8_i32 : i32 to vector<1x16xi32>
    %51 = arith.cmpi slt, %49, %50 : vector<1x16xi32>
    %cst_26 = arith.constant 0.000000e+00 : f32
    %cst_27 = arith.constant -1.000000e+30 : f32
    %52 = vector.broadcast %cst_26 : f32 to vector<1x16xf32>
    %53 = vector.broadcast %cst_27 : f32 to vector<1x16xf32>
    %54 = arith.select %51, %52, %53 : vector<1x16xi1>, vector<1x16xf32>
    %55 = vector.extract_strided_slice %36 {offsets = [0, 0], sizes = [16, 8], strides = [1, 1]} : vector<16x32xbf16> to vector<16x8xbf16>
    %56 = vector.extract_strided_slice %42 {offsets = [0, 0], sizes = [16, 8], strides = [1, 1]} : vector<16x32xbf16> to vector<16x8xbf16>
    %57 = vector.extract_strided_slice %48 {offsets = [0, 0], sizes = [16, 8], strides = [1, 1]} : vector<16x32xbf16> to vector<16x8xbf16>
    %cst_28 = arith.constant dense<0.000000e+00> : vector<16x16xf32>
    %58 = tpu.matmul %55, %56, %cst_28 {dimension_numbers = #tpu.dot_dimension_numbers<[1], [1], [0], [0], [0, 0, 1, 0], [], []>} : vector<16x8xbf16>, vector<16x8xbf16>, vector<16x16xf32> -> vector<16x16xf32>
    %59 = vector.broadcast %54 : vector<1x16xf32> to vector<16x16xf32>
    %60 = arith.addf %58, %59 : vector<16x16xf32>
    %cst_29 = arith.constant dense<0xFF800000> : vector<16xf32>
    %61 = vector.multi_reduction <maximumf>, %60, %cst_29 [1] : vector<16x16xf32> to vector<16xf32>
    %62 = vector.shape_cast %61 : vector<16xf32> to vector<16x1xf32>
    %63 = vector.broadcast %62 : vector<16x1xf32> to vector<16x16xf32>
    %64 = arith.subf %60, %63 : vector<16x16xf32>
    %65 = math.exp %64 : vector<16x16xf32>
    %cst_30 = arith.constant dense<0.000000e+00> : vector<16xf32>
    %66 = vector.multi_reduction <add>, %65, %cst_30 [1] : vector<16x16xf32> to vector<16xf32>
    %67 = vector.shape_cast %66 : vector<16xf32> to vector<16x1xf32>
    %68 = tpu.reciprocal %67 {approx = true} : vector<16x1xf32> -> vector<16x1xf32>
    %69 = vector.broadcast %68 : vector<16x1xf32> to vector<16x16xf32>
    %70 = arith.mulf %65, %69 : vector<16x16xf32>
    %71 = arith.truncf %70 : vector<16x16xf32> to vector<16x16xbf16>
    %cst_31 = arith.constant dense<0.000000e+00> : vector<16x8xf32>
    %72 = tpu.matmul %71, %57, %cst_31 {dimension_numbers = #tpu.dot_dimension_numbers<[1], [0], [0], [1], [0, 0, 1, 1], [], []>} : vector<16x16xbf16>, vector<16x8xbf16>, vector<16x8xf32> -> vector<16x8xf32>
    %73 = vector.extract_strided_slice %36 {offsets = [0, 8], sizes = [16, 8], strides = [1, 1]} : vector<16x32xbf16> to vector<16x8xbf16>
    %74 = vector.extract_strided_slice %42 {offsets = [0, 8], sizes = [16, 8], strides = [1, 1]} : vector<16x32xbf16> to vector<16x8xbf16>
    %75 = vector.extract_strided_slice %48 {offsets = [0, 8], sizes = [16, 8], strides = [1, 1]} : vector<16x32xbf16> to vector<16x8xbf16>
    %cst_32 = arith.constant dense<0.000000e+00> : vector<16x16xf32>
    %76 = tpu.matmul %73, %74, %cst_32 {dimension_numbers = #tpu.dot_dimension_numbers<[1], [1], [0], [0], [0, 0, 1, 0], [], []>} : vector<16x8xbf16>, vector<16x8xbf16>, vector<16x16xf32> -> vector<16x16xf32>
    %77 = vector.broadcast %54 : vector<1x16xf32> to vector<16x16xf32>
    %78 = arith.addf %76, %77 : vector<16x16xf32>
    %cst_33 = arith.constant dense<0xFF800000> : vector<16xf32>
    %79 = vector.multi_reduction <maximumf>, %78, %cst_33 [1] : vector<16x16xf32> to vector<16xf32>
    %80 = vector.shape_cast %79 : vector<16xf32> to vector<16x1xf32>
    %81 = vector.broadcast %80 : vector<16x1xf32> to vector<16x16xf32>
    %82 = arith.subf %78, %81 : vector<16x16xf32>
    %83 = math.exp %82 : vector<16x16xf32>
    %cst_34 = arith.constant dense<0.000000e+00> : vector<16xf32>
    %84 = vector.multi_reduction <add>, %83, %cst_34 [1] : vector<16x16xf32> to vector<16xf32>
    %85 = vector.shape_cast %84 : vector<16xf32> to vector<16x1xf32>
    %86 = tpu.reciprocal %85 {approx = true} : vector<16x1xf32> -> vector<16x1xf32>
    %87 = vector.broadcast %86 : vector<16x1xf32> to vector<16x16xf32>
    %88 = arith.mulf %83, %87 : vector<16x16xf32>
    %89 = arith.truncf %88 : vector<16x16xf32> to vector<16x16xbf16>
    %cst_35 = arith.constant dense<0.000000e+00> : vector<16x8xf32>
    %90 = tpu.matmul %89, %75, %cst_35 {dimension_numbers = #tpu.dot_dimension_numbers<[1], [0], [0], [1], [0, 0, 1, 1], [], []>} : vector<16x16xbf16>, vector<16x8xbf16>, vector<16x8xf32> -> vector<16x8xf32>
    %91 = tpu.concatenate %72, %90 in 1 : vector<16x8xf32>, vector<16x8xf32> -> vector<16x16xf32>
    %92 = arith.truncf %91 : vector<16x16xf32> to vector<16x16xbf16>
    %c0_36 = arith.constant 0 : index
    %c0_37 = arith.constant 0 : index
    %93 = vector.load %arg19[%c0_36, %c0_37] : memref<16x32xbf16, #tpu.memory_space<vmem>>, vector<16x16xbf16>
    tpu.vector_store %arg19[%c0_36, %c0_37], %92 {strides = array<i32>} : memref<16x32xbf16, #tpu.memory_space<vmem>>, vector<16x16xbf16>,
    %94 = vector.extract_strided_slice %36 {offsets = [0, 16], sizes = [16, 8], strides = [1, 1]} : vector<16x32xbf16> to vector<16x8xbf16>
    %95 = vector.extract_strided_slice %42 {offsets = [0, 16], sizes = [16, 8], strides = [1, 1]} : vector<16x32xbf16> to vector<16x8xbf16>
    %96 = vector.extract_strided_slice %48 {offsets = [0, 16], sizes = [16, 8], strides = [1, 1]} : vector<16x32xbf16> to vector<16x8xbf16>
    %cst_38 = arith.constant dense<0.000000e+00> : vector<16x16xf32>
    %97 = tpu.matmul %94, %95, %cst_38 {dimension_numbers = #tpu.dot_dimension_numbers<[1], [1], [0], [0], [0, 0, 1, 0], [], []>} : vector<16x8xbf16>, vector<16x8xbf16>, vector<16x16xf32> -> vector<16x16xf32>
    %98 = vector.broadcast %54 : vector<1x16xf32> to vector<16x16xf32>
    %99 = arith.addf %97, %98 : vector<16x16xf32>
    %cst_39 = arith.constant dense<0xFF800000> : vector<16xf32>
    %100 = vector.multi_reduction <maximumf>, %99, %cst_39 [1] : vector<16x16xf32> to vector<16xf32>
    %101 = vector.shape_cast %100 : vector<16xf32> to vector<16x1xf32>
    %102 = vector.broadcast %101 : vector<16x1xf32> to vector<16x16xf32>
    %103 = arith.subf %99, %102 : vector<16x16xf32>
    %104 = math.exp %103 : vector<16x16xf32>
    %cst_40 = arith.constant dense<0.000000e+00> : vector<16xf32>
    %105 = vector.multi_reduction <add>, %104, %cst_40 [1] : vector<16x16xf32> to vector<16xf32>
    %106 = vector.shape_cast %105 : vector<16xf32> to vector<16x1xf32>
    %107 = tpu.reciprocal %106 {approx = true} : vector<16x1xf32> -> vector<16x1xf32>
    %108 = vector.broadcast %107 : vector<16x1xf32> to vector<16x16xf32>
    %109 = arith.mulf %104, %108 : vector<16x16xf32>
    %110 = arith.truncf %109 : vector<16x16xf32> to vector<16x16xbf16>
    %cst_41 = arith.constant dense<0.000000e+00> : vector<16x8xf32>
    %111 = tpu.matmul %110, %96, %cst_41 {dimension_numbers = #tpu.dot_dimension_numbers<[1], [0], [0], [1], [0, 0, 1, 1], [], []>} : vector<16x16xbf16>, vector<16x8xbf16>, vector<16x8xf32> -> vector<16x8xf32>
    %112 = vector.extract_strided_slice %36 {offsets = [0, 24], sizes = [16, 8], strides = [1, 1]} : vector<16x32xbf16> to vector<16x8xbf16>
    %113 = vector.extract_strided_slice %42 {offsets = [0, 24], sizes = [16, 8], strides = [1, 1]} : vector<16x32xbf16> to vector<16x8xbf16>
    %114 = vector.extract_strided_slice %48 {offsets = [0, 24], sizes = [16, 8], strides = [1, 1]} : vector<16x32xbf16> to vector<16x8xbf16>
    %cst_42 = arith.constant dense<0.000000e+00> : vector<16x16xf32>
    %115 = tpu.matmul %112, %113, %cst_42 {dimension_numbers = #tpu.dot_dimension_numbers<[1], [1], [0], [0], [0, 0, 1, 0], [], []>} : vector<16x8xbf16>, vector<16x8xbf16>, vector<16x16xf32> -> vector<16x16xf32>
    %116 = vector.broadcast %54 : vector<1x16xf32> to vector<16x16xf32>
    %117 = arith.addf %115, %116 : vector<16x16xf32>
    %cst_43 = arith.constant dense<0xFF800000> : vector<16xf32>
    %118 = vector.multi_reduction <maximumf>, %117, %cst_43 [1] : vector<16x16xf32> to vector<16xf32>
    %119 = vector.shape_cast %118 : vector<16xf32> to vector<16x1xf32>
    %120 = vector.broadcast %119 : vector<16x1xf32> to vector<16x16xf32>
    %121 = arith.subf %117, %120 : vector<16x16xf32>
    %122 = math.exp %121 : vector<16x16xf32>
    %cst_44 = arith.constant dense<0.000000e+00> : vector<16xf32>
    %123 = vector.multi_reduction <add>, %122, %cst_44 [1] : vector<16x16xf32> to vector<16xf32>
    %124 = vector.shape_cast %123 : vector<16xf32> to vector<16x1xf32>
    %125 = tpu.reciprocal %124 {approx = true} : vector<16x1xf32> -> vector<16x1xf32>
    %126 = vector.broadcast %125 : vector<16x1xf32> to vector<16x16xf32>
    %127 = arith.mulf %122, %126 : vector<16x16xf32>
    %128 = arith.truncf %127 : vector<16x16xf32> to vector<16x16xbf16>
    %cst_45 = arith.constant dense<0.000000e+00> : vector<16x8xf32>
    %129 = tpu.matmul %128, %114, %cst_45 {dimension_numbers = #tpu.dot_dimension_numbers<[1], [0], [0], [1], [0, 0, 1, 1], [], []>} : vector<16x16xbf16>, vector<16x8xbf16>, vector<16x8xf32> -> vector<16x8xf32>
    %130 = tpu.concatenate %111, %129 in 1 : vector<16x8xf32>, vector<16x8xf32> -> vector<16x16xf32>
    %131 = arith.truncf %130 : vector<16x16xf32> to vector<16x16xbf16>
    %c0_46 = arith.constant 0 : index
    %c16 = arith.constant 16 : index
    %132 = vector.load %arg19[%c0_46, %c16] : memref<16x32xbf16, #tpu.memory_space<vmem>>, vector<16x16xbf16>
    tpu.vector_store %arg19[%c0_46, %c16], %131 {strides = array<i32>} : memref<16x32xbf16, #tpu.memory_space<vmem>>, vector<16x16xbf16>,
    %c0_47 = arith.constant 0 : index
    %c0_48 = arith.constant 0 : index
    %133 = vector.load %arg19[%c0_47, %c0_48] : memref<16x32xbf16, #tpu.memory_space<vmem>>, vector<16x32xbf16>
    %c0_49 = arith.constant 0 : index
    %c0_50 = arith.constant 0 : index
    %134 = vector.load %arg10[%c0_49, %c0_50] : memref<32x32xbf16, #tpu.memory_space<vmem>>, vector<32x32xbf16>
    %cst_51 = arith.constant dense<0.000000e+00> : vector<16x32xf32>
    %135 = tpu.matmul %133, %134, %cst_51 {dimension_numbers = #tpu.dot_dimension_numbers<[1], [0], [0], [1], [0, 0, 1, 1], [], []>} : vector<16x32xbf16>, vector<32x32xbf16>, vector<16x32xf32> -> vector<16x32xf32>
    %c0_52 = arith.constant 0 : index
    %c0_53 = arith.constant 0 : index
    %136 = vector.load %arg11[%c0_52, %c0_53] : memref<1x32xf32, #tpu.memory_space<vmem>>, vector<1x32xf32>
    %137 = vector.broadcast %136 : vector<1x32xf32> to vector<16x32xf32>
    %138 = arith.addf %135, %137 : vector<16x32xf32>
    %139 = arith.addf %138, %1 : vector<16x32xf32>
    %c0_54 = arith.constant 0 : index
    %c0_55 = arith.constant 0 : index
    %140 = vector.load %arg12[%c0_54, %c0_55] : memref<1x32xf32, #tpu.memory_space<vmem>>, vector<1x32xf32>
    %c0_56 = arith.constant 0 : index
    %c0_57 = arith.constant 0 : index
    %141 = vector.load %arg13[%c0_56, %c0_57] : memref<1x32xf32, #tpu.memory_space<vmem>>, vector<1x32xf32>
    %cst_58 = arith.constant dense<0.000000e+00> : vector<16xf32>
    %142 = vector.multi_reduction <add>, %139, %cst_58 [1] : vector<16x32xf32> to vector<16xf32>
    %143 = vector.shape_cast %142 : vector<16xf32> to vector<16x1xf32>
    %cst_59 = arith.constant 3.200000e+01 : f32
    %144 = vector.broadcast %cst_59 : f32 to vector<16x1xf32>
    %145 = arith.divf %143, %144 : vector<16x1xf32>
    %146 = vector.broadcast %145 : vector<16x1xf32> to vector<16x32xf32>
    %147 = arith.subf %139, %146 : vector<16x32xf32>
    %148 = vector.broadcast %145 : vector<16x1xf32> to vector<16x32xf32>
    %149 = arith.subf %139, %148 : vector<16x32xf32>
    %150 = arith.mulf %147, %149 : vector<16x32xf32>
    %cst_60 = arith.constant dense<0.000000e+00> : vector<16xf32>
    %151 = vector.multi_reduction <add>, %150, %cst_60 [1] : vector<16x32xf32> to vector<16xf32>
    %152 = vector.shape_cast %151 : vector<16xf32> to vector<16x1xf32>
    %cst_61 = arith.constant 3.200000e+01 : f32
    %153 = vector.broadcast %cst_61 : f32 to vector<16x1xf32>
    %154 = arith.divf %152, %153 : vector<16x1xf32>
    %155 = vector.broadcast %145 : vector<16x1xf32> to vector<16x32xf32>
    %156 = arith.subf %139, %155 : vector<16x32xf32>
    %cst_62 = arith.constant 9.99999974E-6 : f32
    %157 = vector.broadcast %cst_62 : f32 to vector<16x1xf32>
    %158 = arith.addf %154, %157 : vector<16x1xf32>
    %159 = math.rsqrt %158 : vector<16x1xf32>
    %160 = vector.broadcast %159 : vector<16x1xf32> to vector<16x32xf32>
    %161 = arith.mulf %156, %160 : vector<16x32xf32>
    %162 = vector.broadcast %140 : vector<1x32xf32> to vector<16x32xf32>
    %163 = arith.mulf %161, %162 : vector<16x32xf32>
    %164 = vector.broadcast %141 : vector<1x32xf32> to vector<16x32xf32>
    %165 = arith.addf %163, %164 : vector<16x32xf32>
    %166 = arith.truncf %165 : vector<16x32xf32> to vector<16x32xbf16>
    %c0_63 = arith.constant 0 : index
    %c0_64 = arith.constant 0 : index
    %167 = vector.load %arg14[%c0_63, %c0_64] : memref<32x64xbf16, #tpu.memory_space<vmem>>, vector<32x64xbf16>
    %cst_65 = arith.constant dense<0.000000e+00> : vector<16x64xf32>
    %168 = tpu.matmul %166, %167, %cst_65 {dimension_numbers = #tpu.dot_dimension_numbers<[1], [0], [0], [1], [0, 0, 1, 1], [], []>} : vector<16x32xbf16>, vector<32x64xbf16>, vector<16x64xf32> -> vector<16x64xf32>
    %c0_66 = arith.constant 0 : index
    %c0_67 = arith.constant 0 : index
    %169 = vector.load %arg15[%c0_66, %c0_67] : memref<1x64xf32, #tpu.memory_space<vmem>>, vector<1x64xf32>
    %170 = vector.broadcast %169 : vector<1x64xf32> to vector<16x64xf32>
    %171 = arith.addf %168, %170 : vector<16x64xf32>
    %172 = arith.mulf %171, %171 : vector<16x64xf32>
    %173 = arith.mulf %171, %172 : vector<16x64xf32>
    %cst_68 = arith.constant 4.471500e-02 : f32
    %174 = vector.broadcast %cst_68 : f32 to vector<16x64xf32>
    %175 = arith.mulf %174, %173 : vector<16x64xf32>
    %176 = arith.addf %171, %175 : vector<16x64xf32>
    %cst_69 = arith.constant 0.797884583 : f32
    %177 = vector.broadcast %cst_69 : f32 to vector<16x64xf32>
    %178 = arith.mulf %177, %176 : vector<16x64xf32>
    %179 = math.tanh %178 : vector<16x64xf32>
    %cst_70 = arith.constant 1.000000e+00 : f32
    %180 = vector.broadcast %cst_70 : f32 to vector<16x64xf32>
    %181 = arith.addf %180, %179 : vector<16x64xf32>
    %cst_71 = arith.constant 5.000000e-01 : f32
    %182 = vector.broadcast %cst_71 : f32 to vector<16x64xf32>
    %183 = arith.mulf %182, %181 : vector<16x64xf32>
    %184 = arith.mulf %171, %183 : vector<16x64xf32>
    %185 = arith.truncf %184 : vector<16x64xf32> to vector<16x64xbf16>
    %c0_72 = arith.constant 0 : index
    %c0_73 = arith.constant 0 : index
    %186 = vector.load %arg16[%c0_72, %c0_73] : memref<64x32xbf16, #tpu.memory_space<vmem>>, vector<64x32xbf16>
    %cst_74 = arith.constant dense<0.000000e+00> : vector<16x32xf32>
    %187 = tpu.matmul %185, %186, %cst_74 {dimension_numbers = #tpu.dot_dimension_numbers<[1], [0], [0], [1], [0, 0, 1, 1], [], []>} : vector<16x64xbf16>, vector<64x32xbf16>, vector<16x32xf32> -> vector<16x32xf32>
    %c0_75 = arith.constant 0 : index
    %c0_76 = arith.constant 0 : index
    %188 = vector.load %arg17[%c0_75, %c0_76] : memref<1x32xf32, #tpu.memory_space<vmem>>, vector<1x32xf32>
    %189 = vector.broadcast %188 : vector<1x32xf32> to vector<16x32xf32>
    %190 = arith.addf %187, %189 : vector<16x32xf32>
    %191 = arith.addf %190, %139 : vector<16x32xf32>
    %c0_77 = arith.constant 0 : index
    %c0_78 = arith.constant 0 : index
    %c0_79 = arith.constant 0 : index
    %192 = vector.load %arg18[%c0_77, %c0_78, %c0_79] : memref<1x16x32xf32, #tpu.memory_space<vmem>>, vector<1x16x32xf32>
    %193 = vector.shape_cast %192 : vector<1x16x32xf32> to vector<16x32xf32>
    %194 = vector.shape_cast %191 : vector<16x32xf32> to vector<1x16x32xf32>
    tpu.vector_store %arg18[%c0_77, %c0_78, %c0_79], %194 {strides = array<i32>} : memref<1x16x32xf32, #tpu.memory_space<vmem>>, vector<1x16x32xf32>,
    return
  }
  func.func @transform_0(%arg0: i32) -> (i32, i32, i32) {
    %c0_i32 = arith.constant 0 : i32
    %c0_i32_0 = arith.constant 0 : i32
    %c0_i32_1 = arith.constant 0 : i32
    return %arg0, %c0_i32, %c0_i32_0 : i32, i32, i32
  }
  func.func @transform_1(%arg0: i32) -> (i32, i32) {
    %c0_i32 = arith.constant 0 : i32
    %c0_i32_0 = arith.constant 0 : i32
    %c0_i32_1 = arith.constant 0 : i32
    return %c0_i32, %c0_i32_0 : i32, i32
  }
  func.func @transform_2(%arg0: i32) -> (i32, i32) {
    %c0_i32 = arith.constant 0 : i32
    %c0_i32_0 = arith.constant 0 : i32
    %c0_i32_1 = arith.constant 0 : i32
    return %c0_i32, %c0_i32_0 : i32, i32
  }
  func.func @transform_3(%arg0: i32) -> (i32, i32) {
    %c0_i32 = arith.constant 0 : i32
    %c0_i32_0 = arith.constant 0 : i32
    %c0_i32_1 = arith.constant 0 : i32
    return %c0_i32, %c0_i32_0 : i32, i32
  }
  func.func @transform_4(%arg0: i32) -> (i32, i32) {
    %c0_i32 = arith.constant 0 : i32
    %c0_i32_0 = arith.constant 0 : i32
    %c0_i32_1 = arith.constant 0 : i32
    return %c0_i32, %c0_i32_0 : i32, i32
  }
  func.func @transform_5(%arg0: i32) -> (i32, i32) {
    %c0_i32 = arith.constant 0 : i32
    %c0_i32_0 = arith.constant 0 : i32
    %c0_i32_1 = arith.constant 0 : i32
    return %c0_i32, %c0_i32_0 : i32, i32
  }
  func.func @transform_6(%arg0: i32) -> (i32, i32) {
    %c0_i32 = arith.constant 0 : i32
    %c0_i32_0 = arith.constant 0 : i32
    %c0_i32_1 = arith.constant 0 : i32
    return %c0_i32, %c0_i32_0 : i32, i32
  }
  func.func @transform_7(%arg0: i32) -> (i32, i32) {
    %c0_i32 = arith.constant 0 : i32
    %c0_i32_0 = arith.constant 0 : i32
    %c0_i32_1 = arith.constant 0 : i32
    return %c0_i32, %c0_i32_0 : i32, i32
  }
  func.func @transform_8(%arg0: i32) -> (i32, i32) {
    %c0_i32 = arith.constant 0 : i32
    %c0_i32_0 = arith.constant 0 : i32
    %c0_i32_1 = arith.constant 0 : i32
    return %c0_i32, %c0_i32_0 : i32, i32
  }
  func.func @transform_9(%arg0: i32) -> (i32, i32) {
    %c0_i32 = arith.constant 0 : i32
    %c0_i32_0 = arith.constant 0 : i32
    %c0_i32_1 = arith.constant 0 : i32
    return %c0_i32, %c0_i32_0 : i32, i32
  }
  func.func @transform_10(%arg0: i32) -> (i32, i32) {
    %c0_i32 = arith.constant 0 : i32
    %c0_i32_0 = arith.constant 0 : i32
    %c0_i32_1 = arith.constant 0 : i32
    return %c0_i32, %c0_i32_0 : i32, i32
  }
  func.func @transform_11(%arg0: i32) -> (i32, i32) {
    %c0_i32 = arith.constant 0 : i32
    %c0_i32_0 = arith.constant 0 : i32
    %c0_i32_1 = arith.constant 0 : i32
    return %c0_i32, %c0_i32_0 : i32, i32
  }
  func.func @transform_12(%arg0: i32) -> (i32, i32) {
    %c0_i32 = arith.constant 0 : i32
    %c0_i32_0 = arith.constant 0 : i32
    %c0_i32_1 = arith.constant 0 : i32
    return %c0_i32, %c0_i32_0 : i32, i32
  }
  func.func @transform_13(%arg0: i32) -> (i32, i32) {
    %c0_i32 = arith.constant 0 : i32
    %c0_i32_0 = arith.constant 0 : i32
    %c0_i32_1 = arith.constant 0 : i32
    return %c0_i32, %c0_i32_0 : i32, i32
  }
  func.func @transform_14(%arg0: i32) -> (i32, i32) {
    %c0_i32 = arith.constant 0 : i32
    %c0_i32_0 = arith.constant 0 : i32
    %c0_i32_1 = arith.constant 0 : i32
    return %c0_i32, %c0_i32_0 : i32, i32
  }
  func.func @transform_15(%arg0: i32) -> (i32, i32) {
    %c0_i32 = arith.constant 0 : i32
    %c0_i32_0 = arith.constant 0 : i32
    %c0_i32_1 = arith.constant 0 : i32
    return %c0_i32, %c0_i32_0 : i32, i32
  }
  func.func @transform_16(%arg0: i32) -> (i32, i32) {
    %c0_i32 = arith.constant 0 : i32
    %c0_i32_0 = arith.constant 0 : i32
    %c0_i32_1 = arith.constant 0 : i32
    return %c0_i32, %c0_i32_0 : i32, i32
  }
  func.func @transform_17(%arg0: i32) -> (i32, i32, i32) {
    %c0_i32 = arith.constant 0 : i32
    %c0_i32_0 = arith.constant 0 : i32
    %c0_i32_1 = arith.constant 0 : i32
    return %arg0, %c0_i32, %c0_i32_0 : i32, i32, i32
  }
}

</mosaic_0001>

<bundles_post_ra>
// kernel: vit_encoder_layer.1
= control target key start
LH: loop header
LB: loop body
LE: loop exit
PB: predicated region body
PF: predicated region fallthrough
CT: control target
= control target key end

     0   :  { %s2123_s0 = inlined_call_operand.vmem [shape: f32[2,16,32], index: 0, kind: input, shape index: {}]   ;;  %s2124_s1 = inlined_call_operand.vmem [shape: f32[1,32], index: 1, kind: input, shape index: {}]   ;;  %s2125_s2 = inlined_call_operand.vmem [shape: f32[1,32], index: 2, kind: input, shape index: {}]   ;;  %s2126_s3 = inlined_call_operand.vmem [shape: bf16[32,32], index: 3, kind: input, shape index: {}]   ;;  %s2127_s4 = inlined_call_operand.vmem [shape: f32[1,32], index: 4, kind: input, shape index: {}]   ;;  %s2128_s5 = inlined_call_operand.vmem [shape: bf16[32,32], index: 5, kind: input, shape index: {}]   ;;  %s2129_s6 = inlined_call_operand.hbm [shape: f32[1,32], index: 6, kind: input, shape index: {}]   ;;  %s2130_s7 = inlined_call_operand.vmem [shape: bf16[32,32], index: 7, kind: input, shape index: {}]   ;;  %s2131_s8 = inlined_call_operand.vmem [shape: f32[1,32], index: 8, kind: input, shape index: {}]   ;;  %s2132_s9 = inlined_call_operand.vmem [shape: bf16[32,32], index: 9, kind: input, shape index: {}]   ;;  %s2133_s10 = inlined_call_operand.hbm [shape: f32[1,32], index: 10, kind: input, shape index: {}]   ;;  %s2134_s11 = inlined_call_operand.vmem [shape: f32[1,32], index: 11, kind: input, shape index: {}]   ;;  %s2135_s12 = inlined_call_operand.vmem [shape: f32[1,32], index: 12, kind: input, shape index: {}]   ;;  %s2136_s13 = inlined_call_operand.vmem [shape: bf16[32,64], index: 13, kind: input, shape index: {}]   ;;  %s2137_s14 = inlined_call_operand.hbm [shape: f32[1,64], index: 14, kind: input, shape index: {}]   ;;  %s2138_s15 = inlined_call_operand.vmem [shape: bf16[64,32], index: 15, kind: input, shape index: {}]   ;;  %s2139_s16 = inlined_call_operand.hbm [shape: f32[1,32], index: 16, kind: input, shape index: {}]   ;;  %s2140_s17 = inlined_call_operand.vmem [shape: f32[2,16,32], index: 17, kind: output, shape index: {}]  }
   0x1   :  { %2141 = sst [smem:[#allocation13_spill]] %s2123_s0 }
   0x2   :  { %2142 = sst [smem:[#allocation14_spill]] %s2124_s1 }
   0x3   :  { %2143 = sst [smem:[#allocation15_spill]] %s2129_s6 }
   0x4   :  { %2144 = sst [smem:[#allocation16_spill]] %s2133_s10 }
   0x5   :  { %22 = vsyncpa [#allocation4], 0 }
   0x6   :  { %23 = vsyncpa [#allocation6], 0 }
   0x7   :  { %24 = vsyncpa [#allocation9], 0  ;;  %s1896_s24 = smov 0  }
   0x8 LB: > { %s2145_s10 = sld [smem:[#allocation16_spill]]  ;;  %s1905_s28 = sadd.s32 4294967295, %s1793_s24   ;;  %s1793_s24 = sphi %s1896_s24, %s30_s24  }
   0x9   : > { %p1425_p0 = scmp.ge.s32.totalorder %s1793_s24, 1  ;;  %p423_p1 = scmp.lt.s32.totalorder %s1793_s24, 3 }
   0xa   : > { %p1562_p2 = scmp.eq.s32.totalorder %s1905_s28, 0  ;;  %s1795_s0 = smov [#allocation5]  }
   0xb   : > { %p1910_p3 = pnand %p1425_p0, %p423_p1  ;;  %s473_s30 = sshll.u32 %s1795_s0, 4  ;;  %s474_s30 = int_to_ptr.vmem [resolvable:$true] %s473_s30 }
   0xc   : > { %s2147_s6 = sld [smem:[#allocation15_spill]]  ;;  %s492_s22 = sshll.u32 %s2137_s14, 4  ;;  %s493_s22 = int_to_ptr.hbm [resolvable:$true] %s492_s22 }
   0xd   : > { %p1549_p4 = pneg %p1910_p3  ;;  %s1796_s25 = smov [#allocation3]  }
   0xe   : > { %s471_s27 = sshll.u32 %s2145_s10, 4  ;;  %s452_s26 = sshll.u32 %s1796_s25, 4  ;;  %s472_s27 = int_to_ptr.hbm [resolvable:$true] %s471_s27  ;;  %s453_s26 = int_to_ptr.vmem [resolvable:$true] %s452_s26 }
   0xf   : > { %p1924_p5 = pnand %p1562_p2, %p1549_p4  ;;  %s1797_s0 = smov [#allocation7]  }
  0x10   : > { %s494_s18 = sshll.u32 %s1797_s0, 4  ;;  %s507_s21 = sshll.u32 %s2139_s16, 4  ;;  %s495_s18 = int_to_ptr.vmem [resolvable:$true] %s494_s18  ;;  %s508_s21 = int_to_ptr.hbm [resolvable:$true] %s507_s21 }
  0x11   : > { %1555 = dma.hbm_to_vmem [thread:$0]  (!%p1924_p5), %s472_s27, 16, %s474_s30, [#allocation6]  }
  0x12   : > { %s450_s1 = sshll.u32 %s2147_s6, 4  ;;  %s1798_s6 = smov [#allocation8]   ;;  %s451_s1 = int_to_ptr.hbm [resolvable:$true] %s450_s1 }
  0x13   : > { %1552 = dma.hbm_to_vmem [thread:$0]  (!%p1924_p5), %s451_s1, 16, %s453_s26, [#allocation4]  }
  0x14   : > { %1558 = dma.hbm_to_vmem [thread:$0]  (!%p1924_p5), %s493_s22, 16, %s495_s18, [#allocation6]  }
  0x15   : > { %s509_s10 = sshll.u32 %s1798_s6, 4  ;;  %530 = sbr.rel (%p1910_p3) target bundleno = 2082 (0x822), region = 88  ;;  %s510_s10 = int_to_ptr.vmem [resolvable:$true] %s509_s10 }
  0x16   : > { %1561 = dma.hbm_to_vmem [thread:$0]  (!%p1924_p5), %s508_s21, 16, %s510_s10, [#allocation9]  }
  0x1a   : > { %1780 = dma.done.wait (%p1562_p2), [#allocation4], 16  }
  0x1b   : > { %1782 = vsyncadd (%p1562_p2), [#allocation4], 4294967280 }
  0x1c   : > { %1784 = dma.done.wait (%p1562_p2), [#allocation6], 32  }
  0x1d   : > { %1786 = vsyncadd (%p1562_p2), [#allocation6], 4294967264 }
  0x1e   : > { %1788 = dma.done.wait (%p1562_p2), [#allocation9], 16  }
  0x1f   : > { %1790 = vsyncadd (%p1562_p2), [#allocation9], 4294967280  ;;  %p598_p6 = scmp.lt.s32.totalorder %s1905_s28, 1  ;;  %s2149_s29 = sld [smem:[#allocation13_spill]]  ;;  %vm613_vm0 = vcmask 261120   ;;  %v1799_v4 = vmov 32.0  }
  0x20   : > { %1609 = vrcp.f32 %v1799_v4  ;;  %v1519_v21 = vld [vmem:[%s2126_s3 + $0x8] sm:$0xff]  ;;  %v1518_v25 = vld [vmem:[%s2126_s3] sm:$0xff]  ;;  %s2150_s1 = sld [smem:[#allocation14_spill]]  ;;  %vm803_vm8 = vcmask 64512   ;;  %s1800_s19 = smov 104   ;;  %vm824_vm10 = vcmask 130048  }
  0x21   : > { %s2152_s28 = smov (!%p598_p6, %s1905_s28), 1  ;;  %v1521_v22 = vld [vmem:[%s2128_s5 + $0x8] sm:$0xff]  ;;  %705 = vmatpush.bf16.msra.mxu0 %v1519_v21  ;;  %v1520_v26 = vld [vmem:[%s2128_s5] sm:$0xff]  ;;  %s1801_s20 = smov 120   ;;  %vm950_vm11 = vcmask 125952   ;;  %vm1107_vm12 = vcmask 257152  }
  0x22   : > { %s1516_s6 = sshll.u32 %s2152_s28, 4  ;;  %v1523_v23 = vld [vmem:[%s2130_s7 + $0x8] sm:$0xff]  ;;  %743 = vmatpush.bf16.msra.mxu1 %v1521_v22  ;;  %v1522_v28 = vld [vmem:[%s2130_s7] sm:$0xff]  ;;  %s1802_s21 = smov 112  }
  0x23   : > { %779 = vmatpush.bf16.msra.mxu2 %v1523_v23  ;;  %v1600_v51 = vld [vmem:[%s2125_s2] ss:$0 sm:$0xff]  ;;  %v1602_v59 = vld [vmem:[#allocation3] ss:$0 sm:$0xff]  ;;  %s1804_s10 = smov 8   ;;  %s1805_s27 = smov 16  }
  0x24   : > { %v1601_v56 = vld [vmem:[%s2127_s4] ss:$0 sm:$0xff]  ;;  %s607_s18 = scalar_lea.vmem %s2140_s17, %s1516_s6 }
  0x25   : > { %s602_s30 = scalar_lea.vmem %s2149_s29, %s1516_s6  ;;  %706 = vmatpush.bf16.msra.mxu0 %v1518_v25 }
  0x26   : > { %v1963_v0 = vld [vmem:[%s602_s30] sm:$0xff]  ;;  %v1967_v2 = vld [vmem:[%s602_s30 + $0x8] sm:$0xff]  ;;  %v1610_v5 = vpop.eup %1609  ;;  %744 = vmatpush.bf16.msra.mxu1 %v1520_v26 }
  0x27   : > { %v614_v1 = vsel %vm613_vm0, %v1963_v0, 0.0  ;;  %v617_v3 = vsel %vm613_vm0, %v1967_v2, 0.0  ;;  %v621_v6 = vmul.f32 32.0, %v1610_v5  ;;  %vm625_vm1 = vweird.f32 %v1610_v5  ;;  %780 = vmatpush.bf16.msra.mxu2 %v1522_v28  ;;  %v1599_v46 = vld [vmem:[%s2150_s1] ss:$0 sm:$0xff] }
  0x28   : > { %615 = vadd.xlane.f32.xlu0 %v614_v1  ;;  %v1603_v1 = vld [vmem:[%s2131_s8] ss:$0 sm:$0xff] }
  0x29   : > { %v622_v7 = vsub.f32 1.0, %v621_v6 }
  0x2b   : > { %v623_v8 = vmul.f32 %v1610_v5, %v622_v7 }
  0x2d   : > { %v624_v9 = vadd.f32 %v1610_v5, %v623_v8 }
  0x2f   : > { %v1971_v10 = vsel %vm625_vm1, %v1610_v5, %v624_v9 }
  0x30   : > { %618 = vadd.xlane.f32.xlu0 %v617_v3 }
  0x9b   : > { %v616_v11 = vpop.xlane.xlu0 %615 }
  0x9c   : > { %v627_v12 = vmul.f32 %v1971_v10, %v616_v11 }
  0x9e   : > { %v629_v13 = vsub.f32 %v1963_v0, %v627_v12 }
  0xa0   : > { %v631_v14 = vmul.f32 %v629_v13, %v629_v13 }
  0xa2   : > { %v633_v15 = vsel %vm613_vm0, %v631_v14, 0.0 }
  0xa3   : > { %634 = vadd.xlane.f32.xlu1 %v633_v15  ;;  %v619_v16 = vpop.xlane.xlu0 %618 }
  0xa4   : > { %v628_v17 = vmul.f32 %v1971_v10, %v619_v16 }
  0xa6   : > { %v630_v18 = vsub.f32 %v1967_v2, %v628_v17 }
  0xa8   : > { %v632_v19 = vmul.f32 %v630_v18, %v630_v18 }
  0xaa   : > { %v636_v20 = vsel %vm613_vm0, %v632_v19, 0.0 }
  0xab   : > { %637 = vadd.xlane.f32.xlu1 %v636_v20 }
 0x116   : > { %v635_v24 = vpop.xlane.xlu1 %634 }
 0x117   : > { %v639_v27 = vmul.f32 %v635_v24, %v1971_v10 }
 0x119   : > { %v641_v29 = vadd.f32 1e-05, %v639_v27 }
 0x11b   : > { %1611 = vrsqrt.f32 %v641_v29  ;;  %vm649_vm3 = vweird.f32 %v641_v29 }
 0x11e   : > { %v638_v30 = vpop.xlane.xlu1 %637 }
 0x11f   : > { %v640_v31 = vmul.f32 %v638_v30, %v1971_v10 }
 0x121   : > { %v1612_v32 = vpop.eup %1611  ;;  %v642_v33 = vadd.f32 1e-05, %v640_v31 }
 0x122   : > { %v644_v34 = vmul.f32 %v1612_v32, %v641_v29  ;;  %vm650_vm2 = vweird.f32 %v1612_v32 }
 0x123   : > { %1613 = vrsqrt.f32 %v642_v33  ;;  %vm651_vm4 = vmor %vm649_vm3, %vm650_vm2  ;;  %vm659_vm6 = vweird.f32 %v642_v33 }
 0x124   : > { %v645_v35 = vmul.f32 %v1612_v32, %v644_v34 }
 0x126   : > { %v646_v36 = vmul.f32 0.5, %v645_v35 }
 0x128   : > { %v647_v37 = vsub.f32 1.5, %v646_v36 }
 0x129   : > { %v1614_v38 = vpop.eup %1613 }
 0x12a   : > { %v648_v39 = vmul.f32 %v1612_v32, %v647_v37  ;;  %v654_v40 = vmul.f32 %v1614_v38, %v642_v33  ;;  %vm660_vm5 = vweird.f32 %v1614_v38  ;;  %v789_v37 = vlaneseq }
 0x12b   : > { %vm661_vm7 = vmor %vm659_vm6, %vm660_vm5 }
 0x12c   : > { %v655_v41 = vmul.f32 %v1614_v38, %v654_v40  ;;  %v652_v42 = vsel %vm651_vm4, %v1612_v32, %v648_v39  ;;  %v1803_v39 = vmov -1e+30   ;;  %vm1305_vm4 = vcmask 523264  }
 0x12d   : > { %v663_v45 = vmul.f32 %v652_v42, %v629_v13 }
 0x12e   : > { %v656_v43 = vmul.f32 0.5, %v655_v41 }
 0x12f   : > { %v668_v50 = vmul.f32 %v1599_v46, %v663_v45 }
 0x130   : > { %v657_v44 = vsub.f32 1.5, %v656_v43 }
 0x131   : > { %v673_v53 = vadd.f32 %v1600_v51, %v668_v50 }
 0x132   : > { %v658_v47 = vmul.f32 %v1614_v38, %v657_v44 }
 0x134   : > { %v662_v48 = vsel %vm661_vm7, %v1614_v38, %v658_v47  ;;  %v790_v38 = vand.u32 127, %v789_v37 }
 0x135   : > { %v664_v49 = vmul.f32 %v662_v48, %v630_v18 }
 0x136   : > { %vm791_vm9 = vcmp.lt.s32.totalorder %v790_v38, 8 }
 0x137   : > { %v669_v52 = vmul.f32 %v1599_v46, %v664_v49  ;;  %v792_v40 = vsel %vm791_vm9, 0.0, %v1803_v39 }
 0x139   : > { %v674_v54 = vadd.f32 %v1600_v51, %v669_v52 }
 0x13b   : > { %v675_v55 = vpack.c.bf16 %v674_v54, %v673_v53 }
 0x13d   : > { %1448 = vmatmul.msk.bf16.vlgmr.msra.gmra.mxu0 %vm613_vm0, %v675_v55  ;;  %1457 = vmatmul.msk.bf16.vlgmr.msra.gmra.mxu1 %vm613_vm0, %v675_v55 }
 0x13e   : > { %1466 = vmatmul.msk.bf16.vlgmr.msra.gmra.mxu2 %vm613_vm0, %v675_v55 }
 0x1ba   : > { %v708_v57 = vpop.f32.mrf.mxu0  ;;  %v746_v58 = vpop.f32.mrf.mxu1 }
 0x1bb   : > { %v709_v60 = vadd.f32 %v1601_v56, %v708_v57  ;;  %v747_v61 = vadd.f32 %v1602_v59, %v746_v58 }
 0x1bd   : > { %v713_v62 = vmul.f32 0.35355338, %v709_v60  ;;  %v751_v5 = vpack.c.bf16 %v747_v61, %v747_v61 }
 0x1bf   : > { %v715_v8 = vpack.c.bf16 %v713_v62, %v713_v62  ;;  %v800_v13 = vunpack.c.l.b16 %v751_v5 }
 0x1c1   : > { %v782_v63 = vpop.f32.mrf.mxu2  ;;  %v795_v16 = vunpack.c.l.b16 %v715_v8 }
 0x1c2   : > { %v710_v3 = vpop.f32.mrf.mxu0  ;;  %v748_v4 = vpop.f32.mrf.mxu1  ;;  %v783_v12 = vadd.f32 %v1603_v1, %v782_v63 }
 0x1c3   : > { %v711_v6 = vadd.f32 %v1601_v56, %v710_v3  ;;  %v749_v7 = vadd.f32 %v1602_v59, %v748_v4 }
 0x1c4   : > { %v787_v20 = vpack.c.bf16 %v783_v12, %v783_v12 }
 0x1c5   : > { %v714_v9 = vmul.f32 0.35355338, %v711_v6  ;;  %v752_v11 = vpack.c.bf16 %v749_v7, %v749_v7 }
 0x1c6   : > { %v850_v25 = vunpack.c.l.b16 %v787_v20 }
 0x1c7   : > { %v716_v14 = vpack.c.bf16 %v714_v9, %v714_v9  ;;  %v801_v15 = vunpack.c.l.b16 %v752_v11 }
 0x1c9   : > { %v796_v17 = vunpack.c.l.b16 %v716_v14  ;;  %v802_v18 = vpack.c.b16 %v801_v15, %v800_v13  ;;  %v784_v19 = vpop.f32.mrf.mxu2 }
 0x1ca   : > { %v785_v21 = vadd.f32 %v1603_v1, %v784_v19 }
 0x1cb   : > { %v797_v22 = vpack.c.b16 %v796_v17, %v795_v16  ;;  %1022 = vrot.lane.b32.xlu0 %v802_v18, %s1800_s19  ;;  %873 = vrot.lane.b32.xlu2 %v802_v18, %s1801_s20  ;;  %v808_v23 = vsel %vm803_vm8, %v802_v18, 0 }
 0x1cc   : > { %v788_v24 = vpack.c.bf16 %v785_v21, %v785_v21  ;;  %817 = vmatpush.bf16.xpose.msra.mxu3 %v808_v23 }
 0x1cd   : > { %1020 = vrot.lane.b32.xlu1 %v797_v22, %s1800_s19 }
 0x1ce   : > { %v851_v26 = vunpack.c.l.b16 %v788_v24 }
 0x1d0   : > { %v2018_v27 = vpack.c.b16 %v851_v26, %v850_v25 }
 0x1d2   : > { %864 = vmatpush.bf16.msrb.mxu0 %v2018_v27 }
 0x1d3   : > { %871 = vrot.lane.b32.xlu2 %v797_v22, %s1801_s20  ;;  %1467 = vmatmul.msk.bf16.vlgmr.msra.gmra.mxu3 %vm803_vm8, %v797_v22 }
 0x1db   : > { %955 = vrot.lane.b32.xlu2 %v802_v18, %s1802_s21 }
 0x1e3   : > { %953 = vrot.lane.b32.xlu2 %v797_v22, %s1802_s21 }
 0x225   : > { %v874_v28 = vpop.permute.xlu2 %873 }
 0x226   : > { %v879_v29 = vsel %vm803_vm8, %v874_v28, 0 }
 0x227   : > { %888 = vmatpush.bf16.xpose.msrb.mxu1 %v879_v29 }
 0x22d   : > { %v872_v30 = vpop.permute.xlu2 %871 }
 0x22e   : > { %1469 = vmatmul.msk.bf16.vlgmr.msrb.gmra.mxu1 %vm803_vm8, %v872_v30 }
 0x235   : > { %v956_v31 = vpop.permute.xlu2 %955 }
 0x236   : > { %v961_v32 = vsel %vm803_vm8, %v956_v31, 0 }
 0x237   : > { %970 = vmatpush.bf16.xpose.msrb.mxu3 %v961_v32 }
 0x23d   : > { %v1023_v33 = vpop.permute.xlu0 %1022  ;;  %v954_v34 = vpop.permute.xlu2 %953 }
 0x23e   : > { %v1028_v35 = vsel %vm803_vm8, %v1023_v33, 0  ;;  %1471 = vmatmul.msk.bf16.vlgmr.msrb.gmra.mxu3 %vm803_vm8, %v954_v34 }
 0x23f   : > { %1037 = vmatpush.bf16.xpose.msra.mxu1 %v1028_v35  ;;  %v1021_v36 = vpop.permute.xlu1 %1020 }
 0x246   : > { %1473 = vmatmul.msk.bf16.vlgmr.msra.gmra.mxu1 %vm803_vm8, %v1021_v36 }
 0x256   : > { %v819_v46 = vpop.f32.mrf.mxu3 }
 0x257   : > { %v820_v48 = vadd.f32 %v819_v46, %v792_v40 }
 0x259   : > { %v825_v49 = vsel %vm824_vm10, %v820_v48, -inf }
 0x25e   : > { %v821_v50 = vpop.f32.mrf.mxu3 }
 0x25f   : > { %v822_v60 = vadd.f32 %v821_v50, %v792_v40 }
 0x261   : > { %v828_v61 = vsel %vm824_vm10, %v822_v60, -inf }
 0x2ab   : > { %v890_v41 = vpop.f32.mrf.mxu1 }
 0x2ac   : > { %v891_v42 = vadd.f32 %v890_v41, %v792_v40 }
 0x2ae   : > { %v895_v43 = vsel %vm824_vm10, %v891_v42, -inf }
 0x2af   : > { %896 = vmax.xlane.f32.xlu2 %v895_v43 }
 0x2b3   : > { %v892_v44 = vpop.f32.mrf.mxu1 }
 0x2b4   : > { %v893_v45 = vadd.f32 %v892_v44, %v792_v40 }
 0x2b6   : > { %v898_v47 = vsel %vm824_vm10, %v893_v45, -inf }
 0x2b7   : > { %899 = vmax.xlane.f32.xlu0 %v898_v47 }
 0x2bf   : > { %826 = vmax.xlane.f32.xlu0 %v825_v49 }
 0x2c1   : > { %v972_v54 = vpop.f32.mrf.mxu3 }
 0x2c2   : > { %v973_v55 = vadd.f32 %v972_v54, %v792_v40 }
 0x2c3   : > { %v1039_v51 = vpop.f32.mrf.mxu1 }
 0x2c4   : > { %v1040_v52 = vadd.f32 %v1039_v51, %v792_v40  ;;  %v977_v59 = vsel %vm824_vm10, %v973_v55, -inf }
 0x2c6   : > { %v1044_v53 = vsel %vm824_vm10, %v1040_v52, -inf }
 0x2c7   : > { %1045 = vmax.xlane.f32.xlu1 %v1044_v53 }
 0x2c9   : > { %v974_v11 = vpop.f32.mrf.mxu3 }
 0x2ca   : > { %v975_v12 = vadd.f32 %v974_v11, %v792_v40 }
 0x2cb   : > { %v1041_v56 = vpop.f32.mrf.mxu1 }
 0x2cc   : > { %v1042_v57 = vadd.f32 %v1041_v56, %v792_v40  ;;  %v980_v16 = vsel %vm824_vm10, %v975_v12, -inf }
 0x2ce   : > { %v1047_v58 = vsel %vm824_vm10, %v1042_v57, -inf }
 0x2cf   : > { %1048 = vmax.xlane.f32.xlu2 %v1047_v58  ;;  %978 = vmax.xlane.f32.xlu1 %v977_v59 }
 0x2d7   : > { %829 = vmax.xlane.f32.xlu2 %v828_v61 }
 0x2ef   : > { %918 = vrot.lane.b32.xlu2 %v2018_v27, %s1801_s20 }
 0x322   : > { %v897_v62 = vpop.xlane.xlu2 %896 }
 0x323   : > { %v901_v63 = vsub.f32 %v891_v42, %v897_v62 }
 0x325   : > { %v903_v1 = vmul.f32 1.442695, %v901_v63 }
 0x327   : > { %1615 = vpow2.f32 %v903_v1 }
 0x32a   : > { %v900_v3 = vpop.xlane.xlu0 %899 }
 0x32b   : > { %v902_v4 = vsub.f32 %v893_v45, %v900_v3 }
 0x32d   : > { %v1616_v5 = vpop.eup %1615  ;;  %v905_v6 = vmul.f32 1.442695, %v902_v4 }
 0x32e   : > { %v907_v7 = vsel %vm824_vm10, %v1616_v5, 0.0 }
 0x32f   : > { %1617 = vpow2.f32 %v905_v6  ;;  %908 = vadd.xlane.f32.xlu1 %v907_v7 }
 0x332   : > { %v827_v17 = vpop.xlane.xlu0 %826 }
 0x333   : > { %v831_v21 = vsub.f32 %v820_v48, %v827_v17 }
 0x335   : > { %v1618_v8 = vpop.eup %1617  ;;  %v833_v24 = vmul.f32 1.442695, %v831_v21 }
 0x336   : > { %v910_v9 = vsel %vm824_vm10, %v1618_v8, 0.0 }
 0x337   : > { %911 = vadd.xlane.f32.xlu0 %v910_v9 }
 0x33a   : > { %v1046_v13 = vpop.xlane.xlu1 %1045 }
 0x33b   : > { %v1050_v14 = vsub.f32 %v1040_v52, %v1046_v13 }
 0x33d   : > { %v1052_v15 = vmul.f32 1.442695, %v1050_v14 }
 0x33f   : > { %1619 = vpow2.f32 %v1052_v15  ;;  %981 = vmax.xlane.f32.xlu0 %v980_v16 }
 0x342   : > { %v1049_v18 = vpop.xlane.xlu2 %1048  ;;  %v979_v25 = vpop.xlane.xlu1 %978 }
 0x343   : > { %v1051_v19 = vsub.f32 %v1042_v57, %v1049_v18  ;;  %v983_v30 = vsub.f32 %v973_v55, %v979_v25 }
 0x345   : > { %v1620_v20 = vpop.eup %1619  ;;  %v1054_v22 = vmul.f32 1.442695, %v1051_v19  ;;  %v985_v33 = vmul.f32 1.442695, %v983_v30 }
 0x346   : > { %v1056_v23 = vsel %vm824_vm10, %v1620_v20, 0.0 }
 0x347   : > { %1621 = vpow2.f32 %v1054_v22  ;;  %1057 = vadd.xlane.f32.xlu1 %v1056_v23 }
 0x348   : > { %1623 = vpow2.f32 %v833_v24 }
 0x34a   : > { %v830_v26 = vpop.xlane.xlu2 %829 }
 0x34b   : > { %v832_v28 = vsub.f32 %v822_v60, %v830_v26 }
 0x34d   : > { %v1622_v29 = vpop.eup %1621  ;;  %v835_v31 = vmul.f32 1.442695, %v832_v28 }
 0x34e   : > { %v1059_v32 = vsel %vm824_vm10, %v1622_v29, 0.0  ;;  %v1624_v35 = vpop.eup %1623 }
 0x34f   : > { %1625 = vpow2.f32 %v835_v31  ;;  %1060 = vadd.xlane.f32.xlu0 %v1059_v32  ;;  %v837_v38 = vsel %vm824_vm10, %v1624_v35, 0.0 }
 0x350   : > { %1627 = vpow2.f32 %v985_v33 }
 0x352   : > { %v919_v34 = vpop.permute.xlu2 %918 }
 0x353   : > { %931 = vmatpush.bf16.msrb.mxu2 %v919_v34 }
 0x355   : > { %v1626_v36 = vpop.eup %1625 }
 0x356   : > { %v840_v37 = vsel %vm824_vm10, %v1626_v36, 0.0  ;;  %v1628_v39 = vpop.eup %1627 }
 0x357   : > { %841 = vadd.xlane.f32.xlu2 %v840_v37  ;;  %838 = vadd.xlane.f32.xlu0 %v837_v38  ;;  %v989_v40 = vsel %vm824_vm10, %v1628_v39, 0.0 }
 0x35f   : > { %990 = vadd.xlane.f32.xlu0 %v989_v40  ;;  %v1525_v40 = vld [vmem:[%s2132_s9] sm:$0xff] }
 0x360   : > { %1067 = vrot.lane.b32.xlu1 %v2018_v27, %s1800_s19 }
 0x368   : > { %1000 = vrot.lane.b32.xlu1 %v2018_v27, %s1802_s21 }
 0x3a2   : > { %v909_v41 = vpop.xlane.xlu1 %908 }
 0x3a3   : > { %1629 = vrcp.f32 %v909_v41 }
 0x3a9   : > { %v1630_v43 = vpop.eup %1629 }
 0x3aa   : > { %v912_v42 = vpop.xlane.xlu0 %911  ;;  %v915_v45 = vmul.f32 %v1630_v43, %v1616_v5 }
 0x3ab   : > { %1631 = vrcp.f32 %v912_v42 }
 0x3b1   : > { %v1632_v44 = vpop.eup %1631 }
 0x3b2   : > { %v916_v46 = vmul.f32 %v1632_v44, %v1618_v8  ;;  %v982_v47 = vpop.xlane.xlu0 %981  ;;  %v1604_v44 = vld [vmem:[#allocation5] ss:$0 sm:$0xff] }
 0x3b3   : > { %v984_v48 = vsub.f32 %v975_v12, %v982_v47 }
 0x3b4   : > { %v917_v49 = vpack.c.bf16 %v916_v46, %v915_v45 }
 0x3b5   : > { %v987_v50 = vmul.f32 1.442695, %v984_v48 }
 0x3b6   : > { %1470 = vmatmul.msk.bf16.vlgmr.msrb.gmra.mxu2 %vm824_vm10, %v917_v49 }
 0x3b7   : > { %1633 = vpow2.f32 %v987_v50 }
 0x3ba   : > { %v1058_v53 = vpop.xlane.xlu1 %1057 }
 0x3bd   : > { %v1634_v51 = vpop.eup %1633 }
 0x3be   : > { %v992_v52 = vsel %vm824_vm10, %v1634_v51, 0.0 }
 0x3bf   : > { %993 = vadd.xlane.f32.xlu0 %v992_v52 }
 0x3c2   : > { %v1061_v27 = vpop.xlane.xlu0 %1060 }
 0x3c3   : > { %1635 = vrcp.f32 %v1061_v27 }
 0x3c4   : > { %1637 = vrcp.f32 %v1058_v53 }
 0x3c9   : > { %v1636_v56 = vpop.eup %1635 }
 0x3ca   : > { %v842_v54 = vpop.xlane.xlu2 %841  ;;  %v839_v55 = vpop.xlane.xlu0 %838  ;;  %v1065_v58 = vmul.f32 %v1636_v56, %v1622_v29 }
 0x3cb   : > { %1639 = vrcp.f32 %v842_v54  ;;  %v1638_v57 = vpop.eup %1637 }
 0x3cc   : > { %1641 = vrcp.f32 %v839_v55  ;;  %v1064_v61 = vmul.f32 %v1638_v57, %v1620_v20 }
 0x3ce   : > { %v1066_v3 = vpack.c.bf16 %v1065_v58, %v1064_v61 }
 0x3d1   : > { %v1640_v59 = vpop.eup %1639 }
 0x3d2   : > { %v1642_v60 = vpop.eup %1641  ;;  %v846_v62 = vmul.f32 %v1640_v59, %v1626_v36  ;;  %v1068_v63 = vpop.permute.xlu1 %1067 }
 0x3d3   : > { %v845_v1 = vmul.f32 %v1642_v60, %v1624_v35  ;;  %1080 = vmatpush.bf16.msra.mxu2 %v1068_v63  ;;  %v991_v6 = vpop.xlane.xlu0 %990  ;;  %v1528_v60 = vld [vmem:[%s2136_s13 + $0x8] sm:$0xff]  ;;  %v1527_v63 = vld [vmem:[%s2136_s13] sm:$0xff] }
 0x3d4   : > { %1643 = vrcp.f32 %v991_v6 }
 0x3d5   : > { %v847_v4 = vpack.c.bf16 %v846_v62, %v845_v1 }
 0x3d6   : > { %1474 = vmatmul.msk.bf16.vlgmr.msra.gmra.mxu2 %vm824_vm10, %v1066_v3 }
 0x3d7   : > { %1468 = vmatmul.msk.bf16.vlgmr.msrb.gmra.mxu0 %vm824_vm10, %v847_v4 }
 0x3da   : > { %v1001_v5 = vpop.permute.xlu1 %1000  ;;  %v1644_v8 = vpop.eup %1643 }
 0x3db   : > { %1013 = vmatpush.bf16.msra.mxu0 %v1001_v5  ;;  %v997_v12 = vmul.f32 %v1644_v8, %v1628_v39  ;;  %v1526_v39 = vld [vmem:[%s2132_s9 + $0x8] sm:$0xff] }
 0x3dc   : > { %1146 = vmatpush.bf16.msra.mxu3 %v1526_v39 }
 0x3df   : > { %1242 = vmatpush.bf16.msrb.mxu0 %v1528_v60 }
 0x3e0   : > { %1147 = vmatpush.bf16.msra.mxu3 %v1525_v40 }
 0x3e3   : > { %1243 = vmatpush.bf16.msrb.mxu0 %v1527_v63 }
 0x432   : > { %v994_v7 = vpop.xlane.xlu0 %993 }
 0x433   : > { %1645 = vrcp.f32 %v994_v7 }
 0x439   : > { %v1646_v9 = vpop.eup %1645  ;;  %v933_v11 = vpop.f32.mrf.mxu2 }
 0x43a   : > { %v998_v13 = vmul.f32 %v1646_v9, %v1634_v51 }
 0x43c   : > { %v999_v14 = vpack.c.bf16 %v998_v13, %v997_v12 }
 0x43e   : > { %1472 = vmatmul.msk.bf16.vlgmr.msra.gmra.mxu0 %vm824_vm10, %v999_v14 }
 0x441   : > { %v935_v15 = vpop.f32.mrf.mxu2 }
 0x442   : > { %v1594_v16 = vpack.i.bf16 %v935_v15, %v933_v11 }
 0x444   : > { %1595 = vrot.lane.b32.xlu1 %v1594_v16, %s1804_s10 }
 0x454   : > { %v866_v20 = vpop.f32.mrf.mxu0 }
 0x459   : > { %v1082_v17 = vpop.f32.mrf.mxu2 }
 0x45c   : > { %v868_v24 = vpop.f32.mrf.mxu0 }
 0x461   : > { %v1084_v18 = vpop.f32.mrf.mxu2 }
 0x462   : > { %v1589_v19 = vpack.i.bf16 %v1084_v18, %v1082_v17 }
 0x464   : > { %1590 = vrot.lane.b32.xlu0 %v1589_v19, %s1804_s10 }
 0x4b6   : > { %v1596_v21 = vpop.permute.xlu1 %1595 }
 0x4b7   : > { %v1598_v22 = vunpack.i.h.bf16 %v1596_v21  ;;  %v1597_v23 = vunpack.i.l.bf16 %v1596_v21 }
 0x4b9   : > { %v946_v25 = vsel %vm803_vm8, %v866_v20, %v1597_v23  ;;  %v947_v26 = vsel %vm803_vm8, %v868_v24, %v1598_v22  ;;  %v1606_v22 = vld [vmem:[%s2135_s12] ss:$0 sm:$0xff] }
 0x4ba   : > { %v948_v28 = vpack.c.bf16 %v946_v25, %v946_v25  ;;  %v949_v29 = vpack.c.bf16 %v947_v26, %v947_v26 }
 0x4bb   : > { %v1015_v30 = vpop.f32.mrf.mxu0 }
 0x4bc   : > { %952 = vst.msk [vmem:[#allocation2 + $0x4] sm:$0xf] %vm950_vm11, %v949_v29 }
 0x4bd   : > { %951 = vst.msk [vmem:[#allocation2] sm:$0xf] %vm950_vm11, %v948_v28 }
 0x4c3   : > { %v1017_v34 = vpop.f32.mrf.mxu0 }
 0x4d6   : > { %v1591_v31 = vpop.permute.xlu0 %1590 }
 0x4d7   : > { %v1593_v32 = vunpack.i.h.bf16 %v1591_v31  ;;  %v1592_v33 = vunpack.i.l.bf16 %v1591_v31  ;;  %v1531_v31 = vld [vmem:[%s2138_s15 + $0x10] sm:$0xff] }
 0x4d9   : > { %v1096_v35 = vsel %vm803_vm8, %v1017_v34, %v1593_v32  ;;  %v1095_v36 = vsel %vm803_vm8, %v1015_v30, %v1592_v33  ;;  %v1532_v30 = vld [vmem:[%s2138_s15 + $0x18] sm:$0xff]  ;;  %v1530_v32 = vld [vmem:[%s2138_s15 + $0x8] sm:$0xff]  ;;  %v1529_v34 = vld [vmem:[%s2138_s15] sm:$0xff] }
 0x4da   : > { %v1098_v37 = vpack.c.bf16 %v1096_v35, %v1096_v35  ;;  %v1097_v38 = vpack.c.bf16 %v1095_v36, %v1095_v36  ;;  %1313 = vmatpush.bf16.msrb.mxu1 %v1532_v30  ;;  %v1607_v33 = vld [vmem:[#allocation7] ss:$0 sm:$0xff] }
 0x4dc   : > { %1103 = vrot.lane.b32.xlu0 %v1098_v37, %s1805_s27  ;;  %1101 = vrot.lane.b32.xlu1 %v1097_v38, %s1805_s27 }
 0x4de   : > { %1314 = vmatpush.bf16.msrb.mxu1 %v1531_v31 }
 0x4e2   : > { %1315 = vmatpush.bf16.msrb.mxu1 %v1530_v32 }
 0x4e6   : > { %1316 = vmatpush.bf16.msrb.mxu1 %v1529_v34 }
 0x54e   : > { %v1104_v41 = vpop.permute.xlu0 %1103  ;;  %v1102_v42 = vpop.permute.xlu1 %1101 }
 0x54f   : > { %1109 = vst.msk [vmem:[#allocation2 + $0x4] sm:$0xf] %vm1107_vm12, %v1104_v41 }
 0x550   : > { %1108 = vst.msk [vmem:[#allocation2] sm:$0xf] %vm1107_vm12, %v1102_v42 }
 0x557   : > { %v1524_v43 = vld [vmem:[#allocation2] sm:$0xff] }
 0x558   : > { %1487 = vmatmul.msk.bf16.vlgmr.msra.gmra.mxu3 %vm613_vm0, %v1524_v43 }
 0x5db   : > { %v1149_v45 = vpop.f32.mrf.mxu3 }
 0x5dc   : > { %v1150_v46 = vadd.f32 %v1604_v44, %v1149_v45 }
 0x5de   : > { %v2069_v47 = vadd.f32 %v1150_v46, %v1963_v0 }
 0x5e0   : > { %v1158_v48 = vsel %vm613_vm0, %v2069_v47, 0.0 }
 0x5e1   : > { %1159 = vadd.xlane.f32.xlu2 %v1158_v48 }
 0x5e3   : > { %v1151_v49 = vpop.f32.mrf.mxu3 }
 0x5e4   : > { %v1152_v50 = vadd.f32 %v1604_v44, %v1151_v49 }
 0x5e6   : > { %v2074_v51 = vadd.f32 %v1152_v50, %v1967_v2 }
 0x5e8   : > { %v1161_v52 = vsel %vm613_vm0, %v2074_v51, 0.0 }
 0x5e9   : > { %1162 = vadd.xlane.f32.xlu1 %v1161_v52 }
 0x654   : > { %v1160_v27 = vpop.xlane.xlu2 %1159 }
 0x655   : > { %v1164_v53 = vmul.f32 %v1160_v27, %v1971_v10 }
 0x657   : > { %v1166_v54 = vsub.f32 %v2069_v47, %v1164_v53 }
 0x659   : > { %v1168_v0 = vmul.f32 %v1166_v54, %v1166_v54 }
 0x65b   : > { %v1170_v55 = vsel %vm613_vm0, %v1168_v0, 0.0 }
 0x65c   : > { %v1163_v56 = vpop.xlane.xlu1 %1162  ;;  %1171 = vadd.xlane.f32.xlu0 %v1170_v55 }
 0x65d   : > { %v1165_v57 = vmul.f32 %v1163_v56, %v1971_v10 }
 0x65f   : > { %v1167_v58 = vsub.f32 %v2074_v51, %v1165_v57 }
 0x661   : > { %v1169_v2 = vmul.f32 %v1167_v58, %v1167_v58 }
 0x663   : > { %v1173_v59 = vsel %vm613_vm0, %v1169_v2, 0.0 }
 0x664   : > { %1174 = vadd.xlane.f32.xlu2 %v1173_v59 }
 0x6cf   : > { %v1172_v61 = vpop.xlane.xlu0 %1171 }
 0x6d0   : > { %v1176_v62 = vmul.f32 %v1172_v61, %v1971_v10 }
 0x6d2   : > { %v1178_v1 = vadd.f32 1e-05, %v1176_v62 }
 0x6d4   : > { %1647 = vrsqrt.f32 %v1178_v1  ;;  %vm1186_vm14 = vweird.f32 %v1178_v1 }
 0x6d7   : > { %v1175_v3 = vpop.xlane.xlu2 %1174 }
 0x6d8   : > { %v1177_v4 = vmul.f32 %v1175_v3, %v1971_v10  ;;  %v1605_v10 = vld [vmem:[%s2134_s11] ss:$0 sm:$0xff] }
 0x6da   : > { %v1648_v5 = vpop.eup %1647  ;;  %v1179_v6 = vadd.f32 1e-05, %v1177_v4 }
 0x6db   : > { %v1181_v7 = vmul.f32 %v1648_v5, %v1178_v1  ;;  %vm1187_vm13 = vweird.f32 %v1648_v5 }
 0x6dc   : > { %1649 = vrsqrt.f32 %v1179_v6  ;;  %vm1188_vm15 = vmor %vm1186_vm14, %vm1187_vm13  ;;  %vm1196_vm2 = vweird.f32 %v1179_v6 }
 0x6dd   : > { %v1182_v8 = vmul.f32 %v1648_v5, %v1181_v7 }
 0x6df   : > { %v1183_v9 = vmul.f32 0.5, %v1182_v8 }
 0x6e1   : > { %v1184_v11 = vsub.f32 1.5, %v1183_v9 }
 0x6e2   : > { %v1650_v12 = vpop.eup %1649 }
 0x6e3   : > { %v1185_v13 = vmul.f32 %v1648_v5, %v1184_v11  ;;  %v1191_v14 = vmul.f32 %v1650_v12, %v1179_v6  ;;  %vm1197_vm1 = vweird.f32 %v1650_v12 }
 0x6e4   : > { %vm1198_vm3 = vmor %vm1196_vm2, %vm1197_vm1 }
 0x6e5   : > { %v1192_v15 = vmul.f32 %v1650_v12, %v1191_v14  ;;  %v1189_v16 = vsel %vm1188_vm15, %v1648_v5, %v1185_v13 }
 0x6e6   : > { %v1200_v19 = vmul.f32 %v1189_v16, %v1166_v54 }
 0x6e7   : > { %v1193_v17 = vmul.f32 0.5, %v1192_v15 }
 0x6e8   : > { %v1205_v23 = vmul.f32 %v1605_v10, %v1200_v19 }
 0x6e9   : > { %v1194_v18 = vsub.f32 1.5, %v1193_v17 }
 0x6ea   : > { %v1210_v26 = vadd.f32 %v1606_v22, %v1205_v23 }
 0x6eb   : > { %v1195_v20 = vmul.f32 %v1650_v12, %v1194_v18 }
 0x6ed   : > { %v1199_v21 = vsel %vm1198_vm3, %v1650_v12, %v1195_v20 }
 0x6ee   : > { %v1201_v24 = vmul.f32 %v1199_v21, %v1167_v58  ;;  %v1608_v58 = vld [vmem:[#allocation8] ss:$0 sm:$0xff] }
 0x6f0   : > { %v1206_v25 = vmul.f32 %v1605_v10, %v1201_v24 }
 0x6f2   : > { %v1211_v28 = vadd.f32 %v1606_v22, %v1206_v25 }
 0x6f4   : > { %v1212_v29 = vpack.c.bf16 %v1211_v28, %v1210_v26 }
 0x6f6   : > { %1496 = vmatmul.msk.bf16.vlgmr.msrb.gmra.mxu0 %vm613_vm0, %v1212_v29 }
 0x773   : > { %v1245_v35 = vpop.f32.mrf.mxu0 }
 0x774   : > { %v1246_v36 = vadd.f32 %v1607_v33, %v1245_v35 }
 0x776   : > { %v1250_v37 = vmul.f32 %v1246_v36, %v1246_v36 }
 0x778   : > { %v1252_v38 = vmul.f32 %v1250_v37, %v1246_v36 }
 0x77a   : > { %v1254_v39 = vmul.f32 0.044715, %v1252_v38 }
 0x77b   : > { %v1247_v40 = vpop.f32.mrf.mxu0 }
 0x77c   : > { %v1256_v41 = vadd.f32 %v1254_v39, %v1246_v36  ;;  %v1248_v42 = vadd.f32 %v1607_v33, %v1247_v40 }
 0x77e   : > { %v1258_v43 = vmul.f32 0.7978846, %v1256_v41  ;;  %v1251_v44 = vmul.f32 %v1248_v42, %v1248_v42 }
 0x780   : > { %v1253_v45 = vmul.f32 %v1251_v44, %v1248_v42  ;;  %1651 = vtanh.f32 %v1258_v43 }
 0x782   : > { %v1255_v46 = vmul.f32 0.044715, %v1253_v45 }
 0x784   : > { %v1257_v48 = vadd.f32 %v1255_v46, %v1248_v42 }
 0x786   : > { %v1259_v49 = vmul.f32 0.7978846, %v1257_v48  ;;  %v1652_v50 = vpop.eup %1651 }
 0x787   : > { %v1262_v52 = vadd.f32 1.0, %v1652_v50 }
 0x788   : > { %1653 = vtanh.f32 %v1259_v49 }
 0x789   : > { %v1264_v53 = vmul.f32 0.5, %v1262_v52 }
 0x78b   : > { %v1266_v55 = vmul.f32 %v1264_v53, %v1246_v36 }
 0x78e   : > { %v1654_v27 = vpop.eup %1653 }
 0x78f   : > { %v1263_v54 = vadd.f32 1.0, %v1654_v27 }
 0x791   : > { %v1265_v0 = vmul.f32 0.5, %v1263_v54 }
 0x793   : > { %v1267_v56 = vmul.f32 %v1265_v0, %v1248_v42 }
 0x795   : > { %v1268_v57 = vpack.c.bf16 %v1267_v56, %v1266_v55 }
 0x797   : > { %1513 = vmatmul.msk.bf16.vlgmr.msrb.gmra.mxu1 %vm1305_vm4, %v1268_v57 }
 0x814   : > { %v1318_v2 = vpop.f32.mrf.mxu1 }
 0x815   : > { %v1319_v59 = vadd.f32 %v1608_v58, %v1318_v2 }
 0x817   : > { %v1323_v60 = vadd.f32 %v1319_v59, %v2069_v47 }
 0x819   : > { %1325 = vst.msk [vmem:[%s607_s18] sm:$0xff] %vm613_vm0, %v1323_v60 }
 0x81c   : > { %v1320_v61 = vpop.f32.mrf.mxu1 }
 0x81d   : > { %v1321_v62 = vadd.f32 %v1608_v58, %v1320_v61 }
 0x81f   : > { %v1324_v63 = vadd.f32 %v1321_v62, %v2074_v51 }
 0x821   : > { %1326 = vst.msk [vmem:[%s607_s18 + $0x8] sm:$0xff] %vm613_vm0, %v1324_v63 }
 0x822 PF: > { %s30_s24 = sadd.s32 1, %s1793_s24  }
 0x823   : > { %p27_p7 = scmp.ge.s32.totalorder %s30_s24, 4  }
 0x825   :  { %29 = sbr.rel (!%p27_p7) target bundleno = 8 (0x8), region = 135 }
 0x82a   :  { %1348 = vsyncpa [#allocation4], 1 }
 0x82b   :  { %1350 = vsyncpa [#allocation4 + $0x1], 1 }
 0x82c   :  { %1351 = vsyncpa [#allocation6], 1 }
 0x82d   :  { %1352 = vsyncpa [#allocation9], 1 }

</bundles_post_ra>
